<compile_context>
chip_gen: v5e
topology: v5e:2x2
jax: 0.10.0
libtpu: 0.0.40
codegen_flags: <defaults>
</compile_context>

<pallas_src>
import functools
import math

import jax
import jax.numpy as jnp
from jax import lax
from jax.experimental import pallas as pl
from jax.experimental.pallas import tpu as pltpu


_VMEM_LIMIT = 40 * 1024 * 1024   # per-call working sets are sized to ~<=16 MB; safe on v7x 64 MiB.
_MASK_VALUE = -1000.0            # ttnn prefill additive causal mask value.


# ------------------------------ small helpers ------------------------------


def _pick_tile(dim, target, align):
    """Largest tile <= target that divides dim and is a multiple of `align`.
    Falls back to the full dim (always a legal block shape). For real Falcon-7B,
    pad model dims to 128-aligned sizes at load time so this never falls back
    to a huge full-dim block."""
    if dim <= target:
        return dim
    t = (target // align) * align
    while t >= align:
        if dim % t == 0:
            return t
        t -= align
    return dim


def _pick_head_group(n_heads, head_dim, lane=128):
    """Smallest head-group that divides n_heads and gives a lane-dense (>=128) block."""
    cap = min(n_heads, 8)
    for hg in range(1, cap + 1):
        if n_heads % hg == 0 and (hg * head_dim) % lane == 0:
            return hg
    return 1


def _rotate_half_2d(x, half):
    return jnp.concatenate([-x[:, half:], x[:, :half]], axis=-1)


# ----------------------------- Pallas kernels ------------------------------


def _layernorm_kernel(x_ref, g_ref, b_ref, o_ref, *, eps):
    x = x_ref[...].astype(jnp.float32)
    mean = jnp.mean(x, axis=-1, keepdims=True)
    xc = x - mean
    var = jnp.mean(xc * xc, axis=-1, keepdims=True)
    o_ref[...] = (xc * lax.rsqrt(var + eps) * g_ref[...] + b_ref[...]).astype(o_ref.dtype)


def layernorm(x, gamma, beta, eps, *, tm_target=256):
    M, H = x.shape
    tm = _pick_tile(M, tm_target, 8)
    return pl.pallas_call(
        functools.partial(_layernorm_kernel, eps=eps),
        out_shape=jax.ShapeDtypeStruct((M, H), x.dtype),
        grid=(M // tm,),
        in_specs=[
            pl.BlockSpec((tm, H), lambda i: (i, 0)),
            pl.BlockSpec((1, H), lambda i: (0, 0)),
            pl.BlockSpec((1, H), lambda i: (0, 0)),
        ],
        out_specs=pl.BlockSpec((tm, H), lambda i: (i, 0)),
        compiler_params=pltpu.CompilerParams(
            dimension_semantics=("parallel",), vmem_limit_bytes=_VMEM_LIMIT),
    )(x, gamma.reshape(1, H), beta.reshape(1, H))


def _matmul_kernel(*refs, activation, num_residuals):
    x_ref, w_ref = refs[0], refs[1]
    res_refs = refs[2:2 + num_residuals]
    o_ref = refs[2 + num_residuals]
    acc_ref = refs[3 + num_residuals]

    @pl.when(pl.program_id(2) == 0)
    def _init():
        acc_ref[...] = jnp.zeros_like(acc_ref)

    acc_ref[...] += jnp.dot(x_ref[...], w_ref[...], preferred_element_type=jnp.float32)

    @pl.when(pl.program_id(2) == pl.num_programs(2) - 1)
    def _finalize():
        acc = acc_ref[...]
        if activation == "gelu":
            # NOTE: tanh-approx GELU (ttnn.gelu fast mode); exact erf GELU differs slightly.
            acc = jax.nn.gelu(acc, approximate=True)
        for r in res_refs:
            acc = acc + r[...].astype(jnp.float32)   # fused residual add in the epilogue
        o_ref[...] = acc.astype(o_ref.dtype)


def matmul(x, w, *, activation=None, residuals=(),
           tm_target=1024, tn_target=512, tk_target=512):
    """K-tiled, pipelined matmul with f32 VMEM accumulator and optional fused residuals.

    tm is raised (cap ~1024) so M/tm is 1-2 and each weight panel is streamed from HBM
    at most twice; the N axis is 'parallel' so v7x's two TensorCores still split work
    even when M/tm == 1."""
    M, K = x.shape
    K2, N = w.shape
    assert K == K2
    tm = _pick_tile(M, tm_target, 8)
    tn = _pick_tile(N, tn_target, 128)
    tk = _pick_tile(K, tk_target, 128)
    in_specs = [
        pl.BlockSpec((tm, tk), lambda i, j, k: (i, k)),
        pl.BlockSpec((tk, tn), lambda i, j, k: (k, j)),
    ] + [pl.BlockSpec((tm, tn), lambda i, j, k: (i, j)) for _ in residuals]
    flops = 2 * M * N * K
    bytes_accessed = 2 * (M * K + K * N + M * N + len(residuals) * M * N)
    return pl.pallas_call(
        functools.partial(_matmul_kernel, activation=activation,
                          num_residuals=len(residuals)),
        out_shape=jax.ShapeDtypeStruct((M, N), x.dtype),
        grid=(M // tm, N // tn, K // tk),
        in_specs=in_specs,
        out_specs=pl.BlockSpec((tm, tn), lambda i, j, k: (i, j)),
        scratch_shapes=[pltpu.VMEM((tm, tn), jnp.float32)],
        compiler_params=pltpu.CompilerParams(
            dimension_semantics=("parallel", "parallel", "arbitrary"),
            vmem_limit_bytes=_VMEM_LIMIT),
        cost_estimate=pl.CostEstimate(
            flops=flops,
            transcendentals=(M * N if activation == "gelu" else 0),
            bytes_accessed=bytes_accessed),
    )(x, w, *residuals)


def _rope_qk_kernel(qkv_ref, cos_ref, sin_ref, q_ref, kv_ref,
                    *, n_heads, head_dim, scale):
    """RoPE (+scale) on all Q heads, RoPE on the single K head, lane-pack [K_rot | V].
    All wide stores are single full-width (lane-dense) stores."""
    half = head_dim // 2
    cos = cos_ref[...]                    # (tm, D) f32
    sin = sin_ref[...]

    # ---- Q: rotate + scale every head, one full-width store -------------------
    q = qkv_ref[:, : n_heads * head_dim].astype(jnp.float32)        # (tm, H*D)
    pieces = []
    for h in range(n_heads):
        qh = q[:, h * head_dim:(h + 1) * head_dim]
        pieces.append(-qh[:, half:])
        pieces.append(qh[:, :half])
    rot_q = jnp.concatenate(pieces, axis=-1)                         # rotate_half per head
    cos_q = jnp.tile(cos, (1, n_heads))
    sin_q = jnp.tile(sin, (1, n_heads))
    q_ref[...] = ((q * cos_q + rot_q * sin_q) * scale).astype(q_ref.dtype)

    # ---- K/V: rotate K, pack [K_rot | V], one full-width store ----------------
    k = qkv_ref[:, n_heads * head_dim:(n_heads + 1) * head_dim].astype(jnp.float32)
    k_rot = (k * cos + _rotate_half_2d(k, half) * sin).astype(kv_ref.dtype)
    v = qkv_ref[:, (n_heads + 1) * head_dim:]
    kv_ref[...] = jnp.concatenate([k_rot, v], axis=-1)


def rope_qk(qkv, cos, sin, *, n_heads, head_dim, scale, tm_target=512):
    """Returns (q_rot [S, H*D] pre-scaled, kv_cat [S, 2*D] with rope'd K)."""
    S, W = qkv.shape
    assert W == (n_heads + 2) * head_dim
    tm = _pick_tile(S, tm_target, 8)
    return pl.pallas_call(
        functools.partial(_rope_qk_kernel, n_heads=n_heads, head_dim=head_dim, scale=scale),
        out_shape=(
            jax.ShapeDtypeStruct((S, n_heads * head_dim), qkv.dtype),
            jax.ShapeDtypeStruct((S, 2 * head_dim), qkv.dtype),
        ),
        grid=(S // tm,),
        in_specs=[
            pl.BlockSpec((tm, W), lambda i: (i, 0)),
            pl.BlockSpec((tm, head_dim), lambda i: (i, 0)),
            pl.BlockSpec((tm, head_dim), lambda i: (i, 0)),
        ],
        out_specs=(
            pl.BlockSpec((tm, n_heads * head_dim), lambda i: (i, 0)),
            pl.BlockSpec((tm, 2 * head_dim), lambda i: (i, 0)),
        ),
        compiler_params=pltpu.CompilerParams(
            dimension_semantics=("parallel",), vmem_limit_bytes=_VMEM_LIMIT),
    )(qkv, cos, sin)


def _flash_mqa_kernel(q_ref, kv_ref, o_ref, m_ref, l_ref, acc_ref,
                      *, hg, head_dim, tq, tkv, mask_value):
    qi = pl.program_id(1)
    kvi = pl.program_id(2)

    @pl.when(kvi == 0)
    def _init():
        m_ref[...] = jnp.full_like(m_ref, -1e30)
        l_ref[...] = jnp.zeros_like(l_ref)
        acc_ref[...] = jnp.zeros_like(acc_ref)

    # Skip kv tiles that lie entirely above the causal diagonal for this q tile
    # (their contribution is exp(-1000 - m) == 0 in f32, matching the additive mask).
    @pl.when(kvi * tkv <= qi * tq + (tq - 1))
    def _compute():
        start = pl.multiple_of(kvi * tkv, tkv)
        k = kv_ref[pl.ds(start, tkv), :head_dim]       # rope'd K (bf16), VMEM-resident
        v = kv_ref[pl.ds(start, tkv), head_dim:]       # V (bf16), VMEM-resident
        row = qi * tq + lax.broadcasted_iota(jnp.int32, (tq, tkv), 0)
        col = kvi * tkv + lax.broadcasted_iota(jnp.int32, (tq, tkv), 1)
        bias = jnp.where(col > row, mask_value, 0.0).astype(jnp.float32)
        # TODO(synk): heads within the group could share one stacked (hg*tq, D) MXU call;
        # kept as a small unrolled per-head loop for simplicity.
        for h in range(hg):
            qh = q_ref[:, h * head_dim:(h + 1) * head_dim]        # pre-rotated, pre-scaled
            s = lax.dot_general(qh, k, (((1,), (1,)), ((), ())),
                                preferred_element_type=jnp.float32) + bias
            m_prev = m_ref[:, h:h + 1]
            l_prev = l_ref[:, h:h + 1]
            m_new = jnp.maximum(m_prev, jnp.max(s, axis=-1, keepdims=True))
            alpha = jnp.exp(m_prev - m_new)
            p = jnp.exp(s - m_new)
            l_ref[:, h:h + 1] = alpha * l_prev + jnp.sum(p, axis=-1, keepdims=True)
            acc_ref[:, h * head_dim:(h + 1) * head_dim] = (
                alpha * acc_ref[:, h * head_dim:(h + 1) * head_dim]
                + jnp.dot(p.astype(v.dtype), v, preferred_element_type=jnp.float32))
            m_ref[:, h:h + 1] = m_new

    @pl.when(kvi == pl.num_programs(2) - 1)
    def _finalize():
        inv = pl.reciprocal(l_ref[...], approx=True)               # (tq, hg) on the EUP
        acc = acc_ref[...]
        pieces = [acc[:, h * head_dim:(h + 1) * head_dim] * inv[:, h:h + 1]
                  for h in range(hg)]
        o_ref[...] = jnp.concatenate(pieces, axis=-1).astype(o_ref.dtype)  # lane-dense store


def flash_mqa(q_rot, kv_cat, *, n_heads, head_dim, tq_target=512, tkv_target=512):
    """Flash-style multi-query attention. Q is pre-rotated/pre-scaled; the packed
    [K_rot | V] buffer is kept fully VMEM-resident (constant index map)."""
    S = q_rot.shape[0]
    hg = _pick_head_group(n_heads, head_dim)
    # For real Falcon-7B (71 heads, head_dim=64) pad to 72 heads so hg*D is 128-lane dense.
    assert (hg * head_dim) % 128 == 0, (
        "head-group block must be 128-lane dense; pad n_heads (e.g. 71 -> 72)")
    tq = _pick_tile(S, tq_target, 8)
    tkv = _pick_tile(S, tkv_target, 128)
    grid = (n_heads // hg, S // tq, S // tkv)
    kernel = functools.partial(
        _flash_mqa_kernel, hg=hg, head_dim=head_dim, tq=tq, tkv=tkv,
        mask_value=_MASK_VALUE)
    return pl.pallas_call(
        kernel,
        out_shape=jax.ShapeDtypeStruct((S, n_heads * head_dim), q_rot.dtype),
        grid=grid,
        in_specs=[
            pl.BlockSpec((tq, hg * head_dim), lambda hi, qi, kvi: (qi, hi)),   # Q group
            pl.BlockSpec((S, 2 * head_dim), lambda hi, qi, kvi: (0, 0)),       # resident KV
        ],
        out_specs=pl.BlockSpec((tq, hg * head_dim), lambda hi, qi, kvi: (qi, hi)),
        scratch_shapes=[
            pltpu.VMEM((tq, hg), jnp.float32),             # running max
            pltpu.VMEM((tq, hg), jnp.float32),             # running denom
            pltpu.VMEM((tq, hg * head_dim), jnp.float32),  # f32 output accumulator
        ],
        compiler_params=pltpu.CompilerParams(
            dimension_semantics=("parallel", "parallel", "arbitrary"),
            vmem_limit_bytes=_VMEM_LIMIT),
    )(q_rot, kv_cat)


# --------------------------- model (glue in JAX) ---------------------------


def init_falcon_params(key, *, vocab, hidden, n_layers, n_heads, dtype=jnp.bfloat16):
    head_dim = hidden // n_heads
    ffn = 4 * hidden
    # For real Falcon-7B checkpoints, zero-pad dims to these alignments at load time
    # (4544->4608 hidden, 71->72 heads, 18176->18432 ffn, qkv 4672->4736).
    assert hidden % 128 == 0 and ffn % 128 == 0
    assert ((n_heads + 2) * head_dim) % 128 == 0
    keys = jax.random.split(key, 1 + 4 * n_layers)
    scale = 0.02

    def nrm(k, shape):
        return (scale * jax.random.normal(k, shape, dtype=jnp.float32)).astype(dtype)

    params = {
        "word_embeddings": nrm(keys[0], (vocab, hidden)),
        "ln_f_gamma": jnp.ones((hidden,), jnp.float32),
        "ln_f_beta": jnp.zeros((hidden,), jnp.float32),
        "layers": [],
    }
    for l in range(n_layers):
        k0, k1, k2, k3 = keys[1 + 4 * l: 1 + 4 * (l + 1)]
        params["layers"].append(
            {
                "ln_gamma": jnp.ones((hidden,), jnp.float32),
                "ln_beta": jnp.zeros((hidden,), jnp.float32),
                # fused QKV, multi-query: H query heads + 1 K head + 1 V head
                "w_qkv": nrm(k0, (hidden, (n_heads + 2) * head_dim)),
                "w_dense": nrm(k1, (hidden, hidden)),
                "w_fc": nrm(k2, (hidden, ffn)),
                "w_proj": nrm(k3, (ffn, hidden)),
            }
        )
    return params


def _rotary_tables(seq, head_dim):
    inv_freq = 1.0 / (10000.0 ** (jnp.arange(0, head_dim, 2, dtype=jnp.float32) / head_dim))
    pos = jnp.arange(seq, dtype=jnp.float32)
    freqs = pos[:, None] * inv_freq[None, :]
    emb = jnp.concatenate([freqs, freqs], axis=-1)  # [S, D]
    return jnp.cos(emb), jnp.sin(emb)


def falcon_model_forward(params, input_ids, *, n_heads, eps=1e-5, use_cache=True):
    # input_ids: [1, S] int32 (prefill: batch=1, S multiple of 32)
    assert input_ids.ndim == 2 and input_ids.shape[0] == 1
    S = input_ids.shape[1]
    assert S % 32 == 0, "For prefill, sequence_size must be multiple of 32!"
    vocab, hidden = params["word_embeddings"].shape
    head_dim = hidden // n_heads
    scale = 1.0 / math.sqrt(head_dim)

    # ttnn.embedding: a pure row gather (DMA), no one-hot matmul.
    h = jnp.take(params["word_embeddings"], input_ids[0], axis=0)  # [S, hidden] bf16

    cos, sin = _rotary_tables(S, head_dim)  # f32 [S, D]

    presents = ()
    for layer in params["layers"]:
        # Falcon-7B parallel layer: a single input LayerNorm computed ONCE, consumed by
        # both the attention QKV matmul and the MLP FC matmul.
        ln_out = layernorm(h, layer["ln_gamma"], layer["ln_beta"], eps)

        # TODO(synk): w_qkv and w_fc could be fused into one wide matmul over the same
        # LN'd slab (single activation read, one long N sweep); kept separate for clarity.
        qkv = matmul(ln_out, layer["w_qkv"])                               # [S,(H+2)*D]
        mlp_hidden = matmul(ln_out, layer["w_fc"], activation="gelu")      # [S, 4*hidden]

        # RoPE (+1/sqrt(D) scale) on Q, RoPE on K, lane-pack [K_rot | V] — one small kernel.
        q_rot, kv_cat = rope_qk(qkv, cos, sin,
                                n_heads=n_heads, head_dim=head_dim, scale=scale)

        # Flash MQA with in-kernel causal mask, VMEM-resident KV, lane-packed [S, H*D] out.
        ctx = flash_mqa(q_rot, kv_cat, n_heads=n_heads, head_dim=head_dim)

        attn_out = matmul(ctx, layer["w_dense"])
        # Parallel attention + MLP + residual, with the adds fused into the proj epilogue.
        h = matmul(mlp_hidden, layer["w_proj"], residuals=(h, attn_out))

        if use_cache:
            presents += (
                (kv_cat[:, :head_dim].reshape(1, S, head_dim),
                 kv_cat[:, head_dim:].reshape(1, S, head_dim)),
            )

    h = layernorm(h, params["ln_f_gamma"], params["ln_f_beta"], eps)
    # unsqueeze_to_4D convention used by the tt model.
    hidden_states = h.reshape(1, 1, S, hidden)
    return hidden_states, presents


# TODO(synk): decode-mode preprocessing (batch=32, seq=1), the optimized sharded-softmax
# prefill masks, fp8 weight quantization for v7x, and the ttnn mesh/cache/profiler plumbing
# are not reproduced; only the standard prefill path is implemented.


if __name__ == "__main__":
    key = jax.random.PRNGKey(0)
    k_param, k_ids = jax.random.split(key)

    # Small shapes (Falcon-like head_dim=64, multi-query, 4x FFN).
    VOCAB, HIDDEN, N_HEADS, N_LAYERS, SEQ = 256, 128, 2, 2, 64

    params = init_falcon_params(
        k_param, vocab=VOCAB, hidden=HIDDEN, n_layers=N_LAYERS, n_heads=N_HEADS
    )
    input_ids = jax.random.randint(k_ids, (1, SEQ), 0, VOCAB, dtype=jnp.int32)

    hidden_states, presents = falcon_model_forward(
        params, input_ids, n_heads=N_HEADS, use_cache=True
    )
    jax.block_until_ready((hidden_states, presents))

    head_dim = HIDDEN // N_HEADS
    assert hidden_states.shape == (1, 1, SEQ, HIDDEN)
    assert len(presents) == N_LAYERS
    assert presents[0][0].shape == (1, SEQ, head_dim)
    assert presents[0][1].shape == (1, SEQ, head_dim)
    assert bool(jnp.all(jnp.isfinite(hidden_states.astype(jnp.float32))))
    print("KERNEL_OK")
</pallas_src>

<mosaic_0001>
module attributes {stable_mosaic.version = 11 : i64} {
  func.func @_layernorm_kernel(%arg0: i32, %arg1: memref<64x128xbf16, #tpu.memory_space<vmem>>, %arg2: memref<1x128xf32, #tpu.memory_space<vmem>>, %arg3: memref<1x128xf32, #tpu.memory_space<vmem>>, %arg4: memref<64x128xbf16, #tpu.memory_space<vmem>>) attributes {dimension_semantics = [#tpu.dimension_semantics<parallel>], iteration_bounds = array<i64: 1>, scalar_prefetch = 0 : i64, scratch_operands = 0 : i64, tpu.core_type = #tpu.core_type<tc>, window_params = [{transform_indices = @transform_0, window_bounds = array<i64: 64, 128>}, {pipeline_mode = #tpu.pipeline_mode<synchronous>, transform_indices = @transform_1, window_bounds = array<i64: 1, 128>}, {pipeline_mode = #tpu.pipeline_mode<synchronous>, transform_indices = @transform_2, window_bounds = array<i64: 1, 128>}, {transform_indices = @transform_3, window_bounds = array<i64: 64, 128>}]} {
    %c0 = arith.constant 0 : index
    %c0_0 = arith.constant 0 : index
    %0 = vector.load %arg1[%c0, %c0_0] : memref<64x128xbf16, #tpu.memory_space<vmem>>, vector<64x128xbf16>
    %1 = arith.extf %0 : vector<64x128xbf16> to vector<64x128xf32>
    %cst = arith.constant dense<0.000000e+00> : vector<64xf32>
    %2 = vector.multi_reduction <add>, %1, %cst [1] : vector<64x128xf32> to vector<64xf32>
    %3 = vector.shape_cast %2 : vector<64xf32> to vector<64x1xf32>
    %cst_1 = arith.constant 1.280000e+02 : f32
    %4 = vector.broadcast %cst_1 : f32 to vector<64x1xf32>
    %5 = arith.divf %3, %4 : vector<64x1xf32>
    %6 = vector.broadcast %5 : vector<64x1xf32> to vector<64x128xf32>
    %7 = arith.subf %1, %6 : vector<64x128xf32>
    %8 = arith.mulf %7, %7 : vector<64x128xf32>
    %cst_2 = arith.constant dense<0.000000e+00> : vector<64xf32>
    %9 = vector.multi_reduction <add>, %8, %cst_2 [1] : vector<64x128xf32> to vector<64xf32>
    %10 = vector.shape_cast %9 : vector<64xf32> to vector<64x1xf32>
    %cst_3 = arith.constant 1.280000e+02 : f32
    %11 = vector.broadcast %cst_3 : f32 to vector<64x1xf32>
    %12 = arith.divf %10, %11 : vector<64x1xf32>
    %cst_4 = arith.constant 9.99999974E-6 : f32
    %13 = vector.broadcast %cst_4 : f32 to vector<64x1xf32>
    %14 = arith.addf %12, %13 : vector<64x1xf32>
    %15 = math.rsqrt %14 : vector<64x1xf32>
    %16 = vector.broadcast %15 : vector<64x1xf32> to vector<64x128xf32>
    %17 = arith.mulf %7, %16 : vector<64x128xf32>
    %c0_5 = arith.constant 0 : index
    %c0_6 = arith.constant 0 : index
    %18 = vector.load %arg2[%c0_5, %c0_6] : memref<1x128xf32, #tpu.memory_space<vmem>>, vector<1x128xf32>
    %19 = vector.broadcast %18 : vector<1x128xf32> to vector<64x128xf32>
    %20 = arith.mulf %17, %19 : vector<64x128xf32>
    %c0_7 = arith.constant 0 : index
    %c0_8 = arith.constant 0 : index
    %21 = vector.load %arg3[%c0_7, %c0_8] : memref<1x128xf32, #tpu.memory_space<vmem>>, vector<1x128xf32>
    %22 = vector.broadcast %21 : vector<1x128xf32> to vector<64x128xf32>
    %23 = arith.addf %20, %22 : vector<64x128xf32>
    %24 = arith.truncf %23 : vector<64x128xf32> to vector<64x128xbf16>
    %c0_9 = arith.constant 0 : index
    %c0_10 = arith.constant 0 : index
    %25 = vector.load %arg4[%c0_9, %c0_10] : memref<64x128xbf16, #tpu.memory_space<vmem>>, vector<64x128xbf16>
    tpu.vector_store %arg4[%c0_9, %c0_10], %24 {strides = array<i32>} : memref<64x128xbf16, #tpu.memory_space<vmem>>, vector<64x128xbf16>,
    return
  }
  func.func @transform_0(%arg0: i32) -> (i32, i32) {
    %c0_i32 = arith.constant 0 : i32
    %c0_i32_0 = arith.constant 0 : i32
    return %arg0, %c0_i32 : i32, i32
  }
  func.func @transform_1(%arg0: i32) -> (i32, i32) {
    %c0_i32 = arith.constant 0 : i32
    %c0_i32_0 = arith.constant 0 : i32
    %c0_i32_1 = arith.constant 0 : i32
    return %c0_i32, %c0_i32_0 : i32, i32
  }
  func.func @transform_2(%arg0: i32) -> (i32, i32) {
    %c0_i32 = arith.constant 0 : i32
    %c0_i32_0 = arith.constant 0 : i32
    %c0_i32_1 = arith.constant 0 : i32
    return %c0_i32, %c0_i32_0 : i32, i32
  }
  func.func @transform_3(%arg0: i32) -> (i32, i32) {
    %c0_i32 = arith.constant 0 : i32
    %c0_i32_0 = arith.constant 0 : i32
    return %arg0, %c0_i32 : i32, i32
  }
}

</mosaic_0001>

<bundles_post_ra>
// kernel: tpu_custom_call.1
= control target key start
LH: loop header
LB: loop body
LE: loop exit
PB: predicated region body
PF: predicated region fallthrough
CT: control target
= control target key end

     0   :  { %8 = vsyncpa [#allocation3], 0  ;;  %s603_s0 = inlined_call_operand.hbm [shape: bf16[64,128], index: 0, kind: input, shape index: {}]   ;;  %s604_s1 = inlined_call_operand.hbm [shape: f32[1,128], index: 1, kind: input, shape index: {}]   ;;  %s605_s2 = inlined_call_operand.vmem [shape: f32[1,128], index: 2, kind: input, shape index: {}]   ;;  %s606_s3 = inlined_call_operand.hbm [shape: bf16[64,128], index: 3, kind: output, shape index: {}]  }
   0x1   :  { %9 = vsyncpa [#allocation6], 0 }
   0x2   :  { %10 = vsyncpa [#allocation4], 0  ;;  %s15_s14 = sshll.u32 %s603_s0, 4  ;;  %s434_s15 = smov [#allocation2]   ;;  %s16_s14 = int_to_ptr.hbm [resolvable:$true] %s15_s14 }
   0x3   :  { %s17_s16 = sshll.u32 %s434_s15, 4  ;;  %s29_s19 = sshll.u32 %s604_s1, 4  ;;  %s18_s16 = int_to_ptr.vmem [resolvable:$true] %s17_s16  ;;  %s30_s19 = int_to_ptr.hbm [resolvable:$true] %s29_s19 }
   0x4   :  { %s435_s20 = smov 64   ;;  %s436_s21 = smov 4  }
   0x5   :  { %23 = dma.hbm_to_vmem [thread:$0]  %s16_s14, 512, %s18_s16, [#allocation3], %s435_s20, %s435_s20, %s436_s21  }
   0x6   :  { %s437_s22 = smov [#allocation5]  }
   0x7   :  { %s31_s23 = sshll.u32 %s437_s22, 4  ;;  %s32_s23 = int_to_ptr.vmem [resolvable:$true] %s31_s23 }
   0x8   :  { %34 = dma.hbm_to_vmem [thread:$0]  %s30_s19, 16, %s32_s23, [#allocation6]  }
   0x9   :  { %428 = dma.done.wait [#allocation3], 512  }
   0xa   :  { %429 = vsyncadd [#allocation3], 4294966784 }
   0xb   :  { %430 = dma.done.wait [#allocation6], 16  }
   0xc   :  { %431 = vsyncadd [#allocation6], 4294967280  ;;  %v325_v0 = vld [vmem:[#allocation2 + $0x10] sm:$0xff]   ;;  %v324_v1 = vld [vmem:[#allocation2 + $0x8] sm:$0xff]   ;;  %v438_v12 = vmov 128.0   ;;  %s274_s27 = sshll.u32 %s606_s3, 4  ;;  %s275_s27 = int_to_ptr.hbm [resolvable:$true] %s274_s27 }
   0xd   :  { %v289_v2 = vld [vmem:[#allocation2] sm:$0xff]   ;;  %v298_v3 = vunpack.c.l.bf16 %v325_v0  ;;  %v294_v4 = vunpack.c.l.bf16 %v324_v1  ;;  %v299_v6 = vunpack.c.h.bf16 %v325_v0  ;;  %v295_v7 = vunpack.c.h.bf16 %v324_v1  ;;  %v326_v9 = vld [vmem:[#allocation2 + $0x18] sm:$0xff]  }
   0xe   :  { %v290_v5 = vunpack.c.l.bf16 %v289_v2  ;;  %v291_v8 = vunpack.c.h.bf16 %v289_v2  ;;  %v303_v10 = vunpack.c.h.bf16 %v326_v9  ;;  %v302_v11 = vunpack.c.l.bf16 %v326_v9 }
   0xf   :  { %69 = vadd.xlane.f32.xlu2 %v298_v3  ;;  %65 = vadd.xlane.f32.xlu1 %v294_v4  ;;  %338 = vrcp.f32 %v438_v12 }
  0x10   :  { %61 = vadd.xlane.f32.xlu0 %v290_v5 }
  0x15   :  { %v339_v13 = vpop.eup %338 }
  0x16   :  { %v78_v14 = vmul.f32 128.0, %v339_v13  ;;  %vm82_vm0 = vweird.f32 %v339_v13 }
  0x17   :  { %71 = vadd.xlane.f32.xlu2 %v299_v6  ;;  %67 = vadd.xlane.f32.xlu1 %v295_v7 }
  0x18   :  { %63 = vadd.xlane.f32.xlu0 %v291_v8  ;;  %v79_v15 = vsub.f32 1.0, %v78_v14 }
  0x1a   :  { %v80_v16 = vmul.f32 %v339_v13, %v79_v15 }
  0x1c   :  { %v81_v17 = vadd.f32 %v339_v13, %v80_v16 }
  0x1e   :  { %v469_v18 = vsel %vm82_vm0, %v339_v13, %v81_v17 }
  0x1f   :  { %75 = vadd.xlane.f32.xlu1 %v303_v10 }
  0x20   :  { %73 = vadd.xlane.f32.xlu0 %v302_v11 }
  0x82   :  { %v70_v19 = vpop.xlane.xlu2 %69  ;;  %v66_v20 = vpop.xlane.xlu1 %65 }
  0x83   :  { %v86_v21 = vmul.f32 %v469_v18, %v66_v20  ;;  %v62_v22 = vpop.xlane.xlu0 %61  ;;  %v88_v36 = vmul.f32 %v469_v18, %v70_v19 }
  0x84   :  { %v84_v23 = vmul.f32 %v469_v18, %v62_v22 }
  0x85   :  { %v473_v24 = vsub.f32 %v294_v4, %v86_v21  ;;  %v497_v41 = vsub.f32 %v298_v3, %v88_v36 }
  0x86   :  { %v475_v25 = vsub.f32 %v290_v5, %v84_v23 }
  0x87   :  { %v102_v26 = vmul.f32 %v473_v24, %v473_v24  ;;  %v104_v46 = vmul.f32 %v497_v41, %v497_v41 }
  0x88   :  { %v100_v27 = vmul.f32 %v475_v25, %v475_v25 }
  0x89   :  { %112 = vadd.xlane.f32.xlu1 %v102_v26 }
  0x8a   :  { %108 = vadd.xlane.f32.xlu2 %v100_v27  ;;  %v72_v28 = vpop.xlane.xlu2 %71  ;;  %v68_v29 = vpop.xlane.xlu1 %67 }
  0x8b   :  { %v89_v30 = vmul.f32 %v469_v18, %v72_v28  ;;  %v87_v31 = vmul.f32 %v469_v18, %v68_v29  ;;  %v64_v32 = vpop.xlane.xlu0 %63 }
  0x8c   :  { %v85_v33 = vmul.f32 %v469_v18, %v64_v32 }
  0x8d   :  { %v484_v34 = vsub.f32 %v299_v6, %v89_v30  ;;  %v486_v35 = vsub.f32 %v295_v7, %v87_v31 }
  0x8e   :  { %v489_v37 = vsub.f32 %v291_v8, %v85_v33 }
  0x8f   :  { %v105_v38 = vmul.f32 %v484_v34, %v484_v34  ;;  %v103_v39 = vmul.f32 %v486_v35, %v486_v35 }
  0x90   :  { %v101_v40 = vmul.f32 %v489_v37, %v489_v37 }
  0x91   :  { %118 = vadd.xlane.f32.xlu1 %v105_v38 }
  0x92   :  { %114 = vadd.xlane.f32.xlu2 %v103_v39  ;;  %110 = vadd.xlane.f32.xlu0 %v101_v40  ;;  %v76_v43 = vpop.xlane.xlu1 %75 }
  0x93   :  { %v74_v42 = vpop.xlane.xlu0 %73  ;;  %v91_v47 = vmul.f32 %v469_v18, %v76_v43 }
  0x94   :  { %v90_v44 = vmul.f32 %v469_v18, %v74_v42 }
  0x95   :  { %v507_v49 = vsub.f32 %v303_v10, %v91_v47 }
  0x96   :  { %v500_v45 = vsub.f32 %v302_v11, %v90_v44 }
  0x97   :  { %v107_v50 = vmul.f32 %v507_v49, %v507_v49 }
  0x98   :  { %v106_v48 = vmul.f32 %v500_v45, %v500_v45 }
  0x9a   :  { %116 = vadd.xlane.f32.xlu0 %v104_v46  ;;  %120 = vadd.xlane.f32.xlu2 %v106_v48 }
  0xa2   :  { %122 = vadd.xlane.f32.xlu0 %v107_v50 }
  0xfc   :  { %v113_v51 = vpop.xlane.xlu1 %112 }
  0xfd   :  { %v126_v52 = vmul.f32 %v113_v51, %v469_v18  ;;  %v109_v53 = vpop.xlane.xlu2 %108 }
  0xfe   :  { %v124_v54 = vmul.f32 %v109_v53, %v469_v18 }
  0xff   :  { %v134_v55 = vadd.f32 1e-05, %v126_v52  ;;  %v551_v52 = vld [vmem:[#allocation5] ss:$0 sm:$0xff] }
 0x100   :  { %v132_v56 = vadd.f32 1e-05, %v124_v54 }
 0x101   :  { %340 = vrsqrt.f32 %v134_v55  ;;  %vm166_vm1 = vweird.f32 %v134_v55 }
 0x102   :  { %342 = vrsqrt.f32 %v132_v56  ;;  %vm146_vm5 = vweird.f32 %v132_v56 }
 0x104   :  { %v119_v57 = vpop.xlane.xlu1 %118 }
 0x105   :  { %v129_v58 = vmul.f32 %v119_v57, %v469_v18  ;;  %v115_v59 = vpop.xlane.xlu2 %114  ;;  %v111_v60 = vpop.xlane.xlu0 %110 }
 0x106   :  { %v127_v61 = vmul.f32 %v115_v59, %v469_v18  ;;  %v125_v62 = vmul.f32 %v111_v60, %v469_v18 }
 0x107   :  { %v341_v63 = vpop.eup %340  ;;  %v516_v0 = vadd.f32 1e-05, %v129_v58 }
 0x108   :  { %v343_v1 = vpop.eup %342  ;;  %v161_v2 = vmul.f32 %v341_v63, %v134_v55  ;;  %v135_v3 = vadd.f32 1e-05, %v127_v61  ;;  %v518_v4 = vadd.f32 1e-05, %v125_v62  ;;  %vm167_vm2 = vweird.f32 %v341_v63  ;;  %v337_v62 = vld [vmem:[%s605_s2] ss:$0 sm:$0xff] }
 0x109   :  { %v141_v5 = vmul.f32 %v343_v1, %v132_v56  ;;  %344 = vrsqrt.f32 %v516_v0  ;;  %vm147_vm3 = vweird.f32 %v343_v1  ;;  %vm535_vm4 = vmor %vm166_vm1, %vm167_vm2  ;;  %vm196_vm10 = vweird.f32 %v516_v0  ;;  %s439_s2 = smov [#allocation7]  }
 0x10a   :  { %v162_v6 = vmul.f32 %v341_v63, %v161_v2  ;;  %346 = vrsqrt.f32 %v135_v3  ;;  %vm539_vm6 = vmor %vm146_vm5, %vm147_vm3  ;;  %vm176_vm7 = vweird.f32 %v135_v3  ;;  %vm156_vm13 = vweird.f32 %v518_v4  ;;  %s272_s24 = sshll.u32 %s439_s2, 4  ;;  %s273_s24 = int_to_ptr.vmem [resolvable:$true] %s272_s24 }
 0x10b   :  { %v142_v7 = vmul.f32 %v343_v1, %v141_v5  ;;  %348 = vrsqrt.f32 %v518_v4 }
 0x10c   :  { %v163_v8 = vmul.f32 0.5, %v162_v6 }
 0x10d   :  { %v143_v9 = vmul.f32 0.5, %v142_v7  ;;  %v121_v10 = vpop.xlane.xlu2 %120  ;;  %v117_v11 = vpop.xlane.xlu0 %116 }
 0x10e   :  { %v164_v12 = vsub.f32 1.5, %v163_v8  ;;  %v130_v13 = vmul.f32 %v121_v10, %v469_v18  ;;  %v128_v14 = vmul.f32 %v117_v11, %v469_v18 }
 0x10f   :  { %v524_v15 = vpop.eup %344  ;;  %v144_v16 = vsub.f32 1.5, %v143_v9 }
 0x110   :  { %v347_v17 = vpop.eup %346  ;;  %v191_v19 = vmul.f32 %v524_v15, %v516_v0  ;;  %v528_v20 = vadd.f32 1e-05, %v130_v13  ;;  %v530_v23 = vadd.f32 1e-05, %v128_v14  ;;  %v165_v26 = vmul.f32 %v341_v63, %v164_v12 }
 0x111   :  { %v349_v21 = vpop.eup %348  ;;  %v171_v22 = vmul.f32 %v347_v17, %v135_v3  ;;  %v145_v27 = vmul.f32 %v343_v1, %v144_v16  ;;  %vm177_vm8 = vweird.f32 %v347_v17  ;;  %vm197_vm11 = vweird.f32 %v524_v15 }
 0x112   :  { %v192_v28 = vmul.f32 %v524_v15, %v191_v19  ;;  %v151_v29 = vmul.f32 %v349_v21, %v518_v4  ;;  %350 = vrsqrt.f32 %v528_v20  ;;  %v169_v40 = vsel %vm535_vm4, %v341_v63, %v165_v26  ;;  %vm178_vm12 = vmor %vm176_vm7, %vm177_vm8 }
 0x113   :  { %v172_v30 = vmul.f32 %v347_v17, %v171_v22  ;;  %352 = vrsqrt.f32 %v530_v23  ;;  %v149_v42 = vsel %vm539_vm6, %v343_v1, %v145_v27  ;;  %vm157_vm9 = vweird.f32 %v349_v21  ;;  %vm573_vm15 = vmor %vm196_vm10, %vm197_vm11 }
 0x114   :  { %v193_v32 = vmul.f32 0.5, %v192_v28  ;;  %v152_v33 = vmul.f32 %v349_v21, %v151_v29  ;;  %v222_v53 = vmul.f32 %v169_v40, %v473_v24  ;;  %v220_v54 = vmul.f32 %v149_v42, %v475_v25  ;;  %vm158_vm14 = vmor %vm156_vm13, %vm157_vm9 }
 0x115   :  { %v173_v38 = vmul.f32 0.5, %v172_v30  ;;  %v123_v39 = vpop.xlane.xlu0 %122  ;;  %vm206_vm0 = vweird.f32 %v528_v20  ;;  %vm186_vm4 = vweird.f32 %v530_v23 }
 0x116   :  { %v153_v43 = vmul.f32 0.5, %v152_v33  ;;  %v131_v44 = vmul.f32 %v123_v39, %v469_v18  ;;  %v194_v46 = vsub.f32 1.5, %v193_v32  ;;  %v234_v63 = vmul.f32 %v551_v52, %v222_v53 }
 0x117   :  { %v174_v47 = vsub.f32 1.5, %v173_v38  ;;  %v232_v1 = vmul.f32 %v551_v52, %v220_v54 }
 0x118   :  { %v154_v48 = vsub.f32 1.5, %v153_v43  ;;  %v549_v50 = vadd.f32 1e-05, %v131_v44  ;;  %v351_v51 = vpop.eup %350  ;;  %v195_v58 = vmul.f32 %v524_v15, %v194_v46  ;;  %v246_v11 = vadd.f32 %v337_v62, %v234_v63 }
 0x119   :  { %v175_v55 = vmul.f32 %v347_v17, %v174_v47  ;;  %v201_v56 = vmul.f32 %v351_v51, %v528_v20  ;;  %v353_v57 = vpop.eup %352  ;;  %v244_v12 = vadd.f32 %v337_v62, %v232_v1  ;;  %vm207_vm1 = vweird.f32 %v351_v51 }
 0x11a   :  { %v155_v18 = vmul.f32 %v349_v21, %v154_v48  ;;  %354 = vrsqrt.f32 %v549_v50  ;;  %v181_v61 = vmul.f32 %v353_v57, %v530_v23  ;;  %v199_v7 = vsel %vm573_vm15, %v524_v15, %v195_v58  ;;  %vm208_vm3 = vmor %vm206_vm0, %vm207_vm1 }
 0x11b   :  { %v179_v59 = vsel %vm178_vm12, %v347_v17, %v175_v55  ;;  %v202_v60 = vmul.f32 %v351_v51, %v201_v56  ;;  %vm187_vm2 = vweird.f32 %v353_v57  ;;  %v225_v17 = vmul.f32 %v199_v7, %v484_v34 }
 0x11c   :  { %v223_v24 = vmul.f32 %v179_v59, %v486_v35  ;;  %v159_v25 = vsel %vm158_vm14, %v349_v21, %v155_v18  ;;  %v182_v5 = vmul.f32 %v353_v57, %v181_v61  ;;  %vm188_vm5 = vmor %vm186_vm4, %vm187_vm2  ;;  %vm216_vm7 = vweird.f32 %v549_v50 }
 0x11d   :  { %v221_v35 = vmul.f32 %v159_v25, %v489_v37  ;;  %v203_v4 = vmul.f32 0.5, %v202_v60  ;;  %v237_v29 = vmul.f32 %v551_v52, %v225_v17 }
 0x11e   :  { %v235_v3 = vmul.f32 %v551_v52, %v223_v24  ;;  %v183_v9 = vmul.f32 0.5, %v182_v5 }
 0x11f   :  { %v233_v6 = vmul.f32 %v551_v52, %v221_v35  ;;  %v204_v0 = vsub.f32 1.5, %v203_v4  ;;  %v249_v23 = vadd.f32 %v337_v62, %v237_v29 }
 0x120   :  { %v247_v8 = vadd.f32 %v337_v62, %v235_v3  ;;  %v355_v10 = vpop.eup %354  ;;  %v184_v14 = vsub.f32 1.5, %v183_v9 }
 0x121   :  { %v245_v13 = vadd.f32 %v337_v62, %v233_v6  ;;  %v205_v37 = vmul.f32 %v351_v51, %v204_v0  ;;  %v211_v16 = vmul.f32 %v355_v10, %v549_v50  ;;  %vm217_vm6 = vweird.f32 %v355_v10 }
 0x122   :  { %v312_v21 = vpack.c.bf16 %v247_v8, %v246_v11  ;;  %v185_v15 = vmul.f32 %v353_v57, %v184_v14  ;;  %vm218_vm8 = vmor %vm216_vm7, %vm217_vm6 }
 0x123   :  { %v307_v19 = vpack.c.bf16 %v245_v13, %v244_v12  ;;  %v212_v22 = vmul.f32 %v355_v10, %v211_v16  ;;  %v209_v26 = vsel %vm208_vm3, %v351_v51, %v205_v37 }
 0x124   :  { %v189_v27 = vsel %vm188_vm5, %v353_v57, %v185_v15  ;;  %327 = vst [vmem:[#allocation7 + $0x8] sm:$0xff] %v312_v21   ;;  %v226_v31 = vmul.f32 %v209_v26, %v500_v45 }
 0x125   :  { %308 = vst [vmem:[#allocation7] sm:$0xff] %v307_v19   ;;  %v213_v28 = vmul.f32 0.5, %v212_v22  ;;  %v224_v30 = vmul.f32 %v189_v27, %v497_v41 }
 0x126   :  { %v238_v38 = vmul.f32 %v551_v52, %v226_v31 }
 0x127   :  { %v214_v34 = vsub.f32 1.5, %v213_v28  ;;  %v236_v20 = vmul.f32 %v551_v52, %v224_v30 }
 0x128   :  { %v250_v45 = vadd.f32 %v337_v62, %v238_v38 }
 0x129   :  { %v215_v32 = vmul.f32 %v355_v10, %v214_v34  ;;  %v248_v33 = vadd.f32 %v337_v62, %v236_v20 }
 0x12b   :  { %v219_v36 = vsel %vm218_vm8, %v355_v10, %v215_v32  ;;  %v317_v40 = vpack.c.bf16 %v249_v23, %v248_v33 }
 0x12c   :  { %v227_v39 = vmul.f32 %v219_v36, %v507_v49 }
 0x12d   :  { %328 = vst [vmem:[#allocation7 + $0x10] sm:$0xff] %v317_v40  }
 0x12e   :  { %v239_v41 = vmul.f32 %v551_v52, %v227_v39 }
 0x130   :  { %v251_v42 = vadd.f32 %v337_v62, %v239_v41 }
 0x132   :  { %v322_v43 = vpack.c.bf16 %v251_v42, %v250_v45 }
 0x134   :  { %329 = vst [vmem:[#allocation7 + $0x18] sm:$0xff] %v322_v43  }
 0x135   :  { %280 = dma.vmem_to_hbm [thread:$0]  %s273_s24, 512, %s275_s27, [#allocation4], %s435_s20, %s435_s20, %s436_s21  }
 0x136   :  { %432 = dma.done.wait [#allocation4], 512  }
 0x137   :  { %433 = vsyncadd [#allocation4], 4294966784 }
 0x138   :  { %285 = vsyncpa [#allocation3], 1 }
 0x139   :  { %286 = vsyncpa [#allocation6], 1 }
 0x13a   :  { %287 = vsyncpa [#allocation4], 1 }

</bundles_post_ra>
